<compile_context>
chip_gen: v7x
topology: tpu7x:2x2x1
jax: 0.10.0
libtpu: 0.0.40
codegen_flags: <defaults>
</compile_context>

<pallas_src>
import functools

import jax
import jax.numpy as jnp
from jax.experimental import pallas as pl
from jax.experimental.pallas import tpu as pltpu


def _round_up(x, m):
    return (x + m - 1) // m * m


def cnn_text_kernel(tok_ref, wconv_ref, mask_ref, wfc_ref, bfc_ref, o_ref, *,
                    k_max, l_chunk):
    """One batch tile of the fused gather -> conv -> ReLU -> max-pool -> FC.

    tok_ref  : (TILE_N, L_IN)           int32  token ids, zero padded in time
    wconv_ref: (K_MAX * V_PAD, CO_PAD)  bf16   fused embed (x) conv weights
                                               (conv bias folded into tap 0)
    mask_ref : (L, CO_PAD)              f32    1.0 where time pos valid per col
    wfc_ref  : (CO_PAD, C_PAD)          bf16   padded FC weight
    bfc_ref  : (1, C_PAD)               f32    padded FC bias
    o_ref    : (TILE_N, C_PAD)          f32    logits (lane dense)
    """
    tile_n = tok_ref.shape[0]
    l_out = mask_ref.shape[0]
    co_pad = wconv_ref.shape[1]
    v_pad = wconv_ref.shape[0] // k_max

    tok = tok_ref[...]                      # (TILE_N, L_IN) int32 (tiny)
    wconv = wconv_ref[...]                  # (K_MAX*V_PAD, CO_PAD) bf16
    iota_v = jax.lax.broadcasted_iota(jnp.int32, (1, 1, v_pad), 2)

    pooled = jnp.zeros((tile_n, co_pad), jnp.float32)
    for c0 in range(0, l_out, l_chunk):     # streaming max-pool over time
        lcz = min(l_chunk, l_out - c0)
        # Windowed one-hot operand: column k*V_PAD + v is 1 iff the token at
        # time position (t + k) equals v.  Built as a lane-aligned concat of
        # K_MAX 128-wide blocks -> (TILE_N, lcz, K_MAX*V_PAD) bf16.
        parts = []
        for k in range(k_max):
            tk = tok[:, c0 + k:c0 + k + lcz]                      # (TILE_N, lcz)
            parts.append((tk[:, :, None] == iota_v).astype(jnp.bfloat16))
        oh = parts[0] if k_max == 1 else jnp.concatenate(parts, axis=-1)

        # Embedding gather + all conv branches + conv bias in ONE lane-dense
        # 640-deep MXU contraction with f32 accumulation.
        conv = jax.lax.dot_general(
            oh, wconv, dimension_numbers=(((2,), (0,)), ((), ())),
            preferred_element_type=jnp.float32)                   # (TILE_N, lcz, CO_PAD)

        # ReLU, then zero time positions outside each branch's valid range
        # (exact: ReLU output >= 0), then running max-over-time.
        conv = jnp.maximum(conv, 0.0) * mask_ref[c0:c0 + lcz, :][None, :, :]
        pooled = jnp.maximum(pooled, jnp.max(conv, axis=1))

    # Dropout: identity (eval mode).  Final linear: lane-dense matmul + bias.
    logits = jnp.dot(pooled.astype(jnp.bfloat16), wfc_ref[...],
                     preferred_element_type=jnp.float32)
    o_ref[...] = logits + bfc_ref[...]


def prepare_params(params, kernel_sizes):
    """One-time parameter merge/pad (hoisted out of the per-call jit path)."""
    f32, bf16 = jnp.float32, jnp.bfloat16
    Ks = tuple(kernel_sizes)
    n_k, k_max = len(Ks), max(Ks)

    embed = params["embed"].astype(f32)                 # (V, D)
    V, D = embed.shape
    Co = params[f"conv_w_{Ks[0]}"].shape[-1]
    C = params["fc_b"].shape[-1]

    CO_PAD = _round_up(n_k * Co, 128)
    C_PAD = _round_up(C, 128)
    V_PAD = _round_up(V, 128)

    embed_pad = jnp.zeros((V_PAD, D), f32).at[:V].set(embed)

    # Merge conv branches along the output-channel axis (zero-pad short taps).
    wc = jnp.zeros((k_max, D, CO_PAD), f32)
    bc = jnp.zeros((CO_PAD,), f32)
    for i, K in enumerate(Ks):
        wc = wc.at[:K, :, i * Co:(i + 1) * Co].set(params[f"conv_w_{K}"].astype(f32))
        bc = bc.at[i * Co:(i + 1) * Co].set(params[f"conv_b_{K}"].reshape(-1).astype(f32))

    # Fuse embedding gather + conv:  W_eff[k, v, c] = sum_d embed[v, d]*wc[k, d, c].
    # The tap-0 one-hot has exactly one hot entry per position, so adding the
    # bias to every vocab row of tap 0 folds the conv bias for free.
    w_eff = jnp.einsum("vd,kdc->kvc", embed_pad, wc)    # (k_max, V_PAD, CO_PAD) f32
    w_eff = w_eff.at[0].add(bc[None, :])
    wconv = w_eff.reshape(k_max * V_PAD, CO_PAD).astype(bf16)

    wfc = (jnp.zeros((CO_PAD, C_PAD), f32)
           .at[:n_k * Co, :C].set(params["fc_w"].astype(f32)).astype(bf16))
    bfc = jnp.zeros((1, C_PAD), f32).at[0, :C].set(params["fc_b"].reshape(-1).astype(f32))

    return {"wconv": wconv, "wfc": wfc, "bfc": bfc}


def cnn_text_forward(tokens, prepped, *, kernel_sizes, kernel_num, class_num,
                     tile_n=256, l_chunk=16):
    """Forward pass matching the PyTorch CNN_Text module in eval mode."""
    Ks = tuple(kernel_sizes)
    k_max = max(Ks)
    Co, C = kernel_num, class_num

    wconv, wfc, bfc = prepped["wconv"], prepped["wfc"], prepped["bfc"]
    CO_PAD = wconv.shape[1]
    C_PAD = wfc.shape[1]

    N, L = tokens.shape
    assert L >= k_max, "sequence shorter than largest conv kernel"
    L_IN = L + k_max - 1

    TILE_N = min(tile_n, _round_up(N, 8))
    # v7x has 2 TensorCores sharded over the "parallel" grid axis: if the batch
    # is big enough to split, keep at least 2 grid steps.
    if N > 128 and _round_up(N, TILE_N) == TILE_N:
        TILE_N = max(8, _round_up(TILE_N // 2, 8))
    N_PAD = _round_up(N, TILE_N)

    f32 = jnp.float32
    # Per-branch time-validity mask (built from Python ints only -> this is a
    # compile-time constant under jit, not per-call work).
    mask = jnp.zeros((L, CO_PAD), f32)
    t_idx = jnp.arange(L)[:, None]
    for i, K in enumerate(Ks):
        valid = (t_idx <= (L - K)).astype(f32)
        mask = mask.at[:, i * Co:(i + 1) * Co].set(jnp.broadcast_to(valid, (L, Co)))

    # Integer-only glue: pad tokens in batch and time (the embedding gather
    # itself happens inside the kernel via the fused one-hot matmul).
    tok = jnp.zeros((N_PAD, L_IN), jnp.int32).at[:N, :L].set(tokens.astype(jnp.int32))

    lc = max(1, min(l_chunk, L))
    kernel = functools.partial(cnn_text_kernel, k_max=k_max, l_chunk=lc)

    out = pl.pallas_call(
        kernel,
        grid=(N_PAD // TILE_N,),
        in_specs=[
            pl.BlockSpec((TILE_N, L_IN), lambda i: (i, 0)),      # token ids
            pl.BlockSpec(wconv.shape, lambda i: (0, 0)),         # fused conv W
            pl.BlockSpec((L, CO_PAD), lambda i: (0, 0)),         # time mask
            pl.BlockSpec((CO_PAD, C_PAD), lambda i: (0, 0)),     # fc W
            pl.BlockSpec((1, C_PAD), lambda i: (0, 0)),          # fc b
        ],
        out_specs=pl.BlockSpec((TILE_N, C_PAD), lambda i: (i, 0)),
        out_shape=jax.ShapeDtypeStruct((N_PAD, C_PAD), f32),
        compiler_params=pltpu.CompilerParams(
            dimension_semantics=("parallel",),
            vmem_limit_bytes=32 * 1024 * 1024),
    )(tok, wconv, mask, wfc, bfc)

    return out[:N, :C]


def reference_forward(tokens, params, kernel_sizes):
    """Pure-JAX f32 reference mirroring the PyTorch module (eval mode)."""
    x = jnp.take(params["embed"], tokens, axis=0)  # (N, L, D)
    N, L, D = x.shape
    feats = []
    for K in kernel_sizes:
        w = params[f"conv_w_{K}"]  # (K, D, Co)
        b = params[f"conv_b_{K}"]  # (1, Co)
        t_out = L - K + 1
        acc = jnp.zeros((N, t_out, w.shape[-1]), jnp.float32)
        for k in range(K):
            acc = acc + jnp.einsum("ntd,dc->ntc", x[:, k:k + t_out, :], w[k])
        acc = jax.nn.relu(acc + b[0][None, None, :])
        feats.append(jnp.max(acc, axis=1))
    feat = jnp.concatenate(feats, axis=1)
    return feat @ params["fc_w"] + params["fc_b"][0]


if __name__ == "__main__":
    # Hyperparameters implied by the module (small, synthetic).
    V = 50          # embed_num (vocab size)
    D = 32          # embed_dim
    Co = 8          # kernel_num
    Ks = (3, 4, 5)  # kernel_sizes
    C = 4           # class_num
    N = 2           # batch
    L = 16          # sequence length

    key = jax.random.PRNGKey(0)
    keys = jax.random.split(key, 4 + 2 * len(Ks))

    params = {
        "embed": 0.1 * jax.random.normal(keys[0], (V, D), jnp.float32),
        "fc_w": 0.1 * jax.random.normal(keys[1], (len(Ks) * Co, C), jnp.float32),
        "fc_b": 0.1 * jax.random.normal(keys[2], (1, C), jnp.float32),
    }
    for i, K in enumerate(Ks):
        params[f"conv_w_{K}"] = 0.1 * jax.random.normal(
            keys[3 + 2 * i], (K, D, Co), jnp.float32)
        params[f"conv_b_{K}"] = 0.1 * jax.random.normal(
            keys[4 + 2 * i], (1, Co), jnp.float32)

    tokens = jax.random.randint(keys[-1], (N, L), 0, V, dtype=jnp.int32)

    # One-time parameter prep (outside the per-call jit path).
    prepped = prepare_params(params, Ks)

    fwd = jax.jit(functools.partial(
        cnn_text_forward, kernel_sizes=Ks, kernel_num=Co, class_num=C))
    logits = fwd(tokens, prepped)
    jax.block_until_ready(logits)

    ref = reference_forward(tokens, params, Ks)
    assert logits.shape == (N, C)
    assert jnp.allclose(logits, ref, rtol=2e-2, atol=2e-2), (logits, ref)

    print("KERNEL_OK")
</pallas_src>

<mosaic_0001>
module attributes {stable_mosaic.version = 11 : i64} {
  func.func @cnn_text_kernel(%arg0: i32, %arg1: memref<8x20xi32, #tpu.memory_space<vmem>>, %arg2: memref<640x128xbf16, #tpu.memory_space<vmem>>, %arg3: memref<16x128xf32, #tpu.memory_space<vmem>>, %arg4: memref<128x128xbf16, #tpu.memory_space<vmem>>, %arg5: memref<1x128xf32, #tpu.memory_space<vmem>>, %arg6: memref<8x128xf32, #tpu.memory_space<vmem>>) attributes {dimension_semantics = [#tpu.dimension_semantics<parallel>], iteration_bounds = array<i64: 1>, scalar_prefetch = 0 : i64, scratch_operands = 0 : i64, tpu.core_type = #tpu.core_type<tc>, window_params = [{transform_indices = @transform_0, window_bounds = array<i64: 8, 20>}, {pipeline_mode = #tpu.pipeline_mode<synchronous>, transform_indices = @transform_1, window_bounds = array<i64: 640, 128>}, {pipeline_mode = #tpu.pipeline_mode<synchronous>, transform_indices = @transform_2, window_bounds = array<i64: 16, 128>}, {pipeline_mode = #tpu.pipeline_mode<synchronous>, transform_indices = @transform_3, window_bounds = array<i64: 128, 128>}, {pipeline_mode = #tpu.pipeline_mode<synchronous>, transform_indices = @transform_4, window_bounds = array<i64: 1, 128>}, {transform_indices = @transform_5, window_bounds = array<i64: 8, 128>}]} {
    %c0 = arith.constant 0 : index
    %c0_0 = arith.constant 0 : index
    %0 = vector.load %arg1[%c0, %c0_0] : memref<8x20xi32, #tpu.memory_space<vmem>>, vector<8x20xi32>
    %c0_1 = arith.constant 0 : index
    %c0_2 = arith.constant 0 : index
    %1 = vector.load %arg2[%c0_1, %c0_2] : memref<640x128xbf16, #tpu.memory_space<vmem>>, vector<640x128xbf16>
    %2 = tpu.iota {dimensions = array<i32: 2>} : vector<1x1x128xi32>
    %cst = arith.constant 0.000000e+00 : f32
    %3 = vector.broadcast %cst : f32 to vector<8x128xf32>
    %4 = vector.extract_strided_slice %0 {offsets = [0, 0], sizes = [8, 16], strides = [1, 1]} : vector<8x20xi32> to vector<8x16xi32>
    %5 = vector.shape_cast %4 : vector<8x16xi32> to vector<8x16x1xi32>
    %6 = vector.broadcast %5 : vector<8x16x1xi32> to vector<8x16x128xi32>
    %7 = vector.broadcast %2 : vector<1x1x128xi32> to vector<8x16x128xi32>
    %8 = arith.cmpi eq, %6, %7 : vector<8x16x128xi32>
    %9 = arith.extui %8 : vector<8x16x128xi1> to vector<8x16x128xi32>
    %10 = arith.sitofp %9 : vector<8x16x128xi32> to vector<8x16x128xf32>
    %11 = arith.truncf %10 : vector<8x16x128xf32> to vector<8x16x128xbf16>
    %12 = vector.extract_strided_slice %0 {offsets = [0, 1], sizes = [8, 16], strides = [1, 1]} : vector<8x20xi32> to vector<8x16xi32>
    %13 = vector.shape_cast %12 : vector<8x16xi32> to vector<8x16x1xi32>
    %14 = vector.broadcast %13 : vector<8x16x1xi32> to vector<8x16x128xi32>
    %15 = vector.broadcast %2 : vector<1x1x128xi32> to vector<8x16x128xi32>
    %16 = arith.cmpi eq, %14, %15 : vector<8x16x128xi32>
    %17 = arith.extui %16 : vector<8x16x128xi1> to vector<8x16x128xi32>
    %18 = arith.sitofp %17 : vector<8x16x128xi32> to vector<8x16x128xf32>
    %19 = arith.truncf %18 : vector<8x16x128xf32> to vector<8x16x128xbf16>
    %20 = vector.extract_strided_slice %0 {offsets = [0, 2], sizes = [8, 16], strides = [1, 1]} : vector<8x20xi32> to vector<8x16xi32>
    %21 = vector.shape_cast %20 : vector<8x16xi32> to vector<8x16x1xi32>
    %22 = vector.broadcast %21 : vector<8x16x1xi32> to vector<8x16x128xi32>
    %23 = vector.broadcast %2 : vector<1x1x128xi32> to vector<8x16x128xi32>
    %24 = arith.cmpi eq, %22, %23 : vector<8x16x128xi32>
    %25 = arith.extui %24 : vector<8x16x128xi1> to vector<8x16x128xi32>
    %26 = arith.sitofp %25 : vector<8x16x128xi32> to vector<8x16x128xf32>
    %27 = arith.truncf %26 : vector<8x16x128xf32> to vector<8x16x128xbf16>
    %28 = vector.extract_strided_slice %0 {offsets = [0, 3], sizes = [8, 16], strides = [1, 1]} : vector<8x20xi32> to vector<8x16xi32>
    %29 = vector.shape_cast %28 : vector<8x16xi32> to vector<8x16x1xi32>
    %30 = vector.broadcast %29 : vector<8x16x1xi32> to vector<8x16x128xi32>
    %31 = vector.broadcast %2 : vector<1x1x128xi32> to vector<8x16x128xi32>
    %32 = arith.cmpi eq, %30, %31 : vector<8x16x128xi32>
    %33 = arith.extui %32 : vector<8x16x128xi1> to vector<8x16x128xi32>
    %34 = arith.sitofp %33 : vector<8x16x128xi32> to vector<8x16x128xf32>
    %35 = arith.truncf %34 : vector<8x16x128xf32> to vector<8x16x128xbf16>
    %36 = vector.extract_strided_slice %0 {offsets = [0, 4], sizes = [8, 16], strides = [1, 1]} : vector<8x20xi32> to vector<8x16xi32>
    %37 = vector.shape_cast %36 : vector<8x16xi32> to vector<8x16x1xi32>
    %38 = vector.broadcast %37 : vector<8x16x1xi32> to vector<8x16x128xi32>
    %39 = vector.broadcast %2 : vector<1x1x128xi32> to vector<8x16x128xi32>
    %40 = arith.cmpi eq, %38, %39 : vector<8x16x128xi32>
    %41 = arith.extui %40 : vector<8x16x128xi1> to vector<8x16x128xi32>
    %42 = arith.sitofp %41 : vector<8x16x128xi32> to vector<8x16x128xf32>
    %43 = arith.truncf %42 : vector<8x16x128xf32> to vector<8x16x128xbf16>
    %44 = tpu.concatenate %11, %19, %27, %35, %43 in 2 : vector<8x16x128xbf16>, vector<8x16x128xbf16>, vector<8x16x128xbf16>, vector<8x16x128xbf16>, vector<8x16x128xbf16> -> vector<8x16x640xbf16>
    %cst_3 = arith.constant dense<0.000000e+00> : vector<8x16x128xf32>
    %45 = tpu.matmul %44, %1, %cst_3 {dimension_numbers = #tpu.dot_dimension_numbers<[2], [0], [0, 1], [1], [0, 0, 0, 1, 1, 1], [], []>} : vector<8x16x640xbf16>, vector<640x128xbf16>, vector<8x16x128xf32> -> vector<8x16x128xf32>
    %cst_4 = arith.constant 0.000000e+00 : f32
    %46 = vector.broadcast %cst_4 : f32 to vector<8x16x128xf32>
    %47 = arith.maximumf %45, %46 : vector<8x16x128xf32>
    %c0_5 = arith.constant 0 : index
    %c0_6 = arith.constant 0 : index
    %48 = vector.load %arg3[%c0_5, %c0_6] : memref<16x128xf32, #tpu.memory_space<vmem>>, vector<16x128xf32>
    %49 = vector.shape_cast %48 : vector<16x128xf32> to vector<1x16x128xf32>
    %50 = vector.broadcast %49 : vector<1x16x128xf32> to vector<8x16x128xf32>
    %51 = arith.mulf %47, %50 : vector<8x16x128xf32>
    %cst_7 = arith.constant dense<0xFF800000> : vector<8x128xf32>
    %52 = vector.multi_reduction <maximumf>, %51, %cst_7 [1] : vector<8x16x128xf32> to vector<8x128xf32>
    %53 = arith.maximumf %3, %52 : vector<8x128xf32>
    %54 = arith.truncf %53 : vector<8x128xf32> to vector<8x128xbf16>
    %c0_8 = arith.constant 0 : index
    %c0_9 = arith.constant 0 : index
    %55 = vector.load %arg4[%c0_8, %c0_9] : memref<128x128xbf16, #tpu.memory_space<vmem>>, vector<128x128xbf16>
    %cst_10 = arith.constant dense<0.000000e+00> : vector<8x128xf32>
    %56 = tpu.matmul %54, %55, %cst_10 {dimension_numbers = #tpu.dot_dimension_numbers<[1], [0], [0], [1], [0, 0, 1, 1], [], []>} : vector<8x128xbf16>, vector<128x128xbf16>, vector<8x128xf32> -> vector<8x128xf32>
    %c0_11 = arith.constant 0 : index
    %c0_12 = arith.constant 0 : index
    %57 = vector.load %arg5[%c0_11, %c0_12] : memref<1x128xf32, #tpu.memory_space<vmem>>, vector<1x128xf32>
    %58 = vector.broadcast %57 : vector<1x128xf32> to vector<8x128xf32>
    %59 = arith.addf %56, %58 : vector<8x128xf32>
    %c0_13 = arith.constant 0 : index
    %c0_14 = arith.constant 0 : index
    %60 = vector.load %arg6[%c0_13, %c0_14] : memref<8x128xf32, #tpu.memory_space<vmem>>, vector<8x128xf32>
    tpu.vector_store %arg6[%c0_13, %c0_14], %59 {strides = array<i32>} : memref<8x128xf32, #tpu.memory_space<vmem>>, vector<8x128xf32>,
    return
  }
  func.func @transform_0(%arg0: i32) -> (i32, i32) {
    %c0_i32 = arith.constant 0 : i32
    %c0_i32_0 = arith.constant 0 : i32
    return %arg0, %c0_i32 : i32, i32
  }
  func.func @transform_1(%arg0: i32) -> (i32, i32) {
    %c0_i32 = arith.constant 0 : i32
    %c0_i32_0 = arith.constant 0 : i32
    %c0_i32_1 = arith.constant 0 : i32
    return %c0_i32, %c0_i32_0 : i32, i32
  }
  func.func @transform_2(%arg0: i32) -> (i32, i32) {
    %c0_i32 = arith.constant 0 : i32
    %c0_i32_0 = arith.constant 0 : i32
    %c0_i32_1 = arith.constant 0 : i32
    return %c0_i32, %c0_i32_0 : i32, i32
  }
  func.func @transform_3(%arg0: i32) -> (i32, i32) {
    %c0_i32 = arith.constant 0 : i32
    %c0_i32_0 = arith.constant 0 : i32
    %c0_i32_1 = arith.constant 0 : i32
    return %c0_i32, %c0_i32_0 : i32, i32
  }
  func.func @transform_4(%arg0: i32) -> (i32, i32) {
    %c0_i32 = arith.constant 0 : i32
    %c0_i32_0 = arith.constant 0 : i32
    %c0_i32_1 = arith.constant 0 : i32
    return %c0_i32, %c0_i32_0 : i32, i32
  }
  func.func @transform_5(%arg0: i32) -> (i32, i32) {
    %c0_i32 = arith.constant 0 : i32
    %c0_i32_0 = arith.constant 0 : i32
    return %arg0, %c0_i32 : i32, i32
  }
}

</mosaic_0001>

<bundles_post_ra>
// kernel: cnn_text_forward.1
= control target key start
LH: loop header
LB: loop body
LE: loop exit
PB: predicated region body
PF: predicated region fallthrough
CT: control target
= control target key end

     0   :  { %10 = vsyncpa [#allocation3], 0  ;;  %s2020_s18 = smov [#allocation2]   ;;  %s2430_s0 = inlined_call_operand.vmem [shape: s32[8,20], index: 0, kind: input, shape index: {}]   ;;  %s2431_s1 = inlined_call_operand.hbm [shape: bf16[640,128], index: 1, kind: input, shape index: {}]   ;;  %s2432_s2 = inlined_call_operand.vmem [shape: f32[16,128], index: 2, kind: input, shape index: {}]   ;;  %s2433_s3 = inlined_call_operand.vmem [shape: bf16[128,128], index: 3, kind: input, shape index: {}]   ;;  %s2434_s4 = inlined_call_operand.vmem [shape: f32[1,128], index: 4, kind: input, shape index: {}]   ;;  %s2435_s5 = inlined_call_operand.vmem [shape: f32[8,128], index: 5, kind: output, shape index: {}]  }
   0x1   :  { %s18_s19 = sshll.u32 %s2020_s18, 4  ;;  %s1996_s22 = scalar_lea.hbm %s2431_s1, 5120  ;;  %s19_s19 = int_to_ptr.vmem [resolvable:$true] %s18_s19 }
   0x2   :  { %p1997_p0 = scmp.ne.s32.totalorder %s2431_s1, %s1996_s22  ;;  %p2000_p1 = scmp.lt.u32.totalorder %s1996_s22, %s2431_s1 }
   0x4   :  { %p2002_p2 = pnand %p2000_p1, %p1997_p0 }
   0x6   :  { %2005 = shalt.err (!%p2002_p2)
}
   0x7   :  { %s2006_s27 = scalar_lea.vmem %s19_s19, 5120  ;;  %p2011_p4 = scmp.lt.s32.totalorder %s19_s19, %s19_s19 }
   0x8   :  { %p2007_p3 = scmp.ne.s32.totalorder %s19_s19, %s2006_s27  ;;  %p2012_p5 = scmp.lt.s32.totalorder %s2006_s27, %s2006_s27 }
   0xa   :  { %p2013_p6 = por %p2012_p5, %p2011_p4 }
   0xc   :  { %p2014_p7 = pnand %p2013_p6, %p2007_p3 }
   0xe   :  { %2017 = shalt.err (!%p2014_p7)
}
   0xf   :  { %s2021_s28 = smov 64   ;;  %s2022_s29 = smov 4  }
  0x10   :  { %24 = dma.hbm_to_vmem [thread:$0]  %s2431_s1, 5120, %s19_s19, [#allocation3], %s2021_s28, %s2021_s28, %s2022_s29  }
  0x11   :  { %2018 = dma.done.wait [#allocation3], 5120  }
  0x12   :  { %2019 = vsyncadd [#allocation3], 4294962176  ;;  %v116_v0 = vlaneseq  ;;  %v2077_v5 = vld [vmem:[%s2430_s0] sm:$0xff]  ;;  %v1950_v12 = vld [vmem:[#allocation2 + $0x48] sm:$0xff]   ;;  %v2023_v57 = vmov 1.0|1.0  }
  0x13   :  { %v1948_v7 = vld [vmem:[#allocation2 + $0x40] sm:$0xff]   ;;  %v1951_v13 = vld [vmem:[#allocation2 + $0x8] sm:$0xff]   ;;  %v1952_v14 = vld [vmem:[#allocation2 + $0x50] sm:$0xff]  }
  0x14   :  { %v2069_v1 = vshrl.u32 %v116_v0, 7  ;;  %v1949_v10 = vld [vmem:[#allocation2] sm:$0xff]   ;;  %1737 = vmatprep.subr.bf16.mxu0 %v1948_v7  ;;  %v1953_v16 = vld [vmem:[#allocation2 + $0x10] sm:$0xff]   ;;  %v1954_v17 = vld [vmem:[#allocation2 + $0x58] sm:$0xff]   ;;  %v2167_v54 = vand.u32 127, %v116_v0 }
  0x15   :  { %1738 = vmatpush3.bf16.msra.mxu0 %v1949_v10  ;;  %v1955_v19 = vld [vmem:[#allocation2 + $0x18] sm:$0xff]   ;;  %v1956_v20 = vld [vmem:[#allocation2 + $0x60] sm:$0xff]   ;;  %v1958_v23 = vld [vmem:[#allocation2 + $0x68] sm:$0xff]  }
  0x16   :  { %v120_v2 = vsub.s32 0, %v2069_v1  ;;  %v186_v3 = vsub.s32 6, %v2069_v1  ;;  %v197_v4 = vsub.s32 7, %v2069_v1  ;;  %v131_v11 = vsub.s32 1, %v2069_v1  ;;  %1739 = vmatprep.subr.bf16.mxu0 %v1950_v12  ;;  %v1957_v22 = vld [vmem:[#allocation2 + $0x20] sm:$0xff]   ;;  %v1959_v27 = vld [vmem:[#allocation2 + $0x28] sm:$0xff]  }
  0x17   :  { %v142_v18 = vsub.s32 2, %v2069_v1  ;;  %v1964_v24 = vld [vmem:[#allocation2 + $0xc0] sm:$0xff]   ;;  %v153_v25 = vsub.s32 3, %v2069_v1  ;;  %v1966_v28 = vld [vmem:[#allocation2 + $0xc8] sm:$0xff]   ;;  %v1960_v29 = vld [vmem:[#allocation2 + $0x70] sm:$0xff]   ;;  %v164_v40 = vsub.s32 4, %v2069_v1 }
  0x18   :  { %v2080_v6 = vrot.slane %v2077_v5, %v120_v2  ;;  %v2083_v8 = vrot.slane %v2077_v5, %v186_v3  ;;  %v2086_v9 = vrot.slane %v2077_v5, %v197_v4  ;;  %v2094_v15 = vrot.slane %v2077_v5, %v131_v11  ;;  %v1965_v26 = vld [vmem:[#allocation2 + $0x80] sm:$0xff]   ;;  %1801 = vmatprep.subr.bf16.mxu1 %v1964_v24  ;;  %v1967_v30 = vld [vmem:[#allocation2 + $0x88] sm:$0xff]   ;;  %v1968_v31 = vld [vmem:[#allocation2 + $0xd0] sm:$0xff]  }
  0x19   :  { %1740 = vmatpush3.bf16.msra.mxu0 %v1951_v13  ;;  %v2102_v21 = vrot.slane %v2077_v5, %v142_v18  ;;  %1802 = vmatpush3.bf16.msra.mxu1 %v1965_v26  ;;  %v2110_v32 = vrot.slane %v2077_v5, %v153_v25  ;;  %v1961_v33 = vld [vmem:[#allocation2 + $0x30] sm:$0xff]   ;;  %v1962_v34 = vld [vmem:[#allocation2 + $0x78] sm:$0xff]   ;;  %v1972_v39 = vld [vmem:[#allocation2 + $0xe0] sm:$0xff]   ;;  %v2122_v45 = vrot.slane %v2077_v5, %v164_v40  ;;  %v175_v49 = vsub.s32 5, %v2069_v1 }
  0x1a   :  { %123 = vbcast.lane.b32.xlu1 %v2080_v6, 256  ;;  %264 = vbcast.lane.b32.xlu0 %v2080_v6, 257  ;;  %v1969_v35 = vld [vmem:[#allocation2 + $0x90] sm:$0xff]   ;;  %v1970_v36 = vld [vmem:[#allocation2 + $0xd8] sm:$0xff]   ;;  %v1973_v41 = vld [vmem:[#allocation2 + $0xa0] sm:$0xff]  }
  0x1b   :  { %1741 = vmatprep.subr.bf16.mxu0 %v1952_v14  ;;  %1803 = vmatprep.subr.bf16.mxu1 %v1966_v28  ;;  %v1963_v37 = vld [vmem:[#allocation2 + $0x38] sm:$0xff]   ;;  %v1974_v42 = vld [vmem:[#allocation2 + $0xe8] sm:$0xff]   ;;  %v1976_v44 = vld [vmem:[#allocation2 + $0xf0] sm:$0xff]   ;;  %v2134_v50 = vrot.slane %v2077_v5, %v175_v49 }
  0x1c   :  { %v1971_v38 = vld [vmem:[#allocation2 + $0x98] sm:$0xff]   ;;  %v1975_v43 = vld [vmem:[#allocation2 + $0xa8] sm:$0xff]   ;;  %v1977_v46 = vld [vmem:[#allocation2 + $0xb0] sm:$0xff]  }
  0x1d   :  { %1742 = vmatpush3.bf16.msra.mxu0 %v1953_v16  ;;  %1804 = vmatpush3.bf16.msra.mxu1 %v1967_v30  ;;  %v1978_v47 = vld [vmem:[#allocation2 + $0xf8] sm:$0xff]   ;;  %v1980_v51 = vld [vmem:[#allocation2 + $0x100] sm:$0xff]   ;;  %v1981_v60 = vld [vmem:[#allocation2 + $0x108] sm:$0xff]  }
  0x1e   :  { %127 = vbcast.lane.b32.xlu1 %v2080_v6, 264  ;;  %268 = vbcast.lane.b32.xlu0 %v2080_v6, 265  ;;  %v1979_v48 = vld [vmem:[#allocation2 + $0xb8] sm:$0xff]   ;;  %v1982_v63 = vld [vmem:[#allocation2 + $0x110] sm:$0xff]   ;;  %v1984_v5 = vld [vmem:[#allocation2 + $0x120] sm:$0xff]  }
  0x1f   :  { %1743 = vmatprep.subr.bf16.mxu0 %v1954_v17  ;;  %1805 = vmatprep.subr.bf16.mxu1 %v1968_v31  ;;  %v1983_v2 = vld [vmem:[#allocation2 + $0x118] sm:$0xff]   ;;  %v1985_v10 = vld [vmem:[#allocation2 + $0x128] sm:$0xff]   ;;  %v1986_v13 = vld [vmem:[#allocation2 + $0x130] sm:$0xff]  }
  0x20   :  { %v1987_v16 = vld [vmem:[#allocation2 + $0x138] sm:$0xff]  }
  0x21   :  { %1744 = vmatpush3.bf16.msra.mxu0 %v1955_v19  ;;  %1806 = vmatpush3.bf16.msra.mxu1 %v1969_v35 }
  0x22   :  { %276 = vbcast.lane.b32.xlu1 %v2094_v15, 265  ;;  %272 = vbcast.lane.b32.xlu0 %v2094_v15, 257 }
  0x23   :  { %1745 = vmatprep.subr.bf16.mxu0 %v1956_v20  ;;  %1807 = vmatprep.subr.bf16.mxu1 %v1970_v36 }
  0x25   :  { %1746 = vmatpush3.bf16.msra.mxu0 %v1957_v22  ;;  %1808 = vmatpush3.bf16.msra.mxu1 %v1971_v38 }
  0x26   :  { %138 = vbcast.lane.b32.xlu1 %v2094_v15, 264  ;;  %134 = vbcast.lane.b32.xlu0 %v2094_v15, 256 }
  0x27   :  { %1747 = vmatprep.subr.bf16.mxu0 %v1958_v23  ;;  %1809 = vmatprep.subr.bf16.mxu1 %v1972_v39 }
  0x29   :  { %1748 = vmatpush3.bf16.msra.mxu0 %v1959_v27  ;;  %1810 = vmatpush3.bf16.msra.mxu1 %v1973_v41 }
  0x2a   :  { %284 = vbcast.lane.b32.xlu1 %v2102_v21, 265  ;;  %280 = vbcast.lane.b32.xlu0 %v2102_v21, 257 }
  0x2b   :  { %1749 = vmatprep.subr.bf16.mxu0 %v1960_v29  ;;  %1811 = vmatprep.subr.bf16.mxu1 %v1974_v42 }
  0x2d   :  { %1750 = vmatpush3.bf16.msra.mxu0 %v1961_v33  ;;  %1812 = vmatpush3.bf16.msra.mxu1 %v1975_v43 }
  0x2e   :  { %149 = vbcast.lane.b32.xlu1 %v2102_v21, 264  ;;  %145 = vbcast.lane.b32.xlu0 %v2102_v21, 256 }
  0x2f   :  { %1751 = vmatprep.subr.bf16.mxu0 %v1962_v34  ;;  %1813 = vmatprep.subr.bf16.mxu1 %v1976_v44 }
  0x31   :  { %1752 = vmatpush3.bf16.msra.mxu0 %v1963_v37  ;;  %1814 = vmatpush3.bf16.msra.mxu1 %v1977_v46 }
  0x32   :  { %292 = vbcast.lane.b32.xlu1 %v2110_v32, 265  ;;  %288 = vbcast.lane.b32.xlu0 %v2110_v32, 257 }
  0x33   :  { %1815 = vmatprep.subr.bf16.mxu1 %v1978_v47  ;;  %1890 = vmatprep.subr.bf16.mxu0 %v1980_v51 }
  0x35   :  { %1816 = vmatpush3.bf16.msra.mxu1 %v1979_v48 }
  0x36   :  { %160 = vbcast.lane.b32.xlu1 %v2110_v32, 264  ;;  %156 = vbcast.lane.b32.xlu0 %v2110_v32, 256 }
  0x3a   :  { %508 = vbcast.lane.b32.xlu1 %v2080_v6, 267  ;;  %504 = vbcast.lane.b32.xlu0 %v2080_v6, 259 }
  0x3e   :  { %388 = vbcast.lane.b32.xlu1 %v2080_v6, 266  ;;  %384 = vbcast.lane.b32.xlu0 %v2080_v6, 258 }
  0x42   :  { %300 = vbcast.lane.b32.xlu1 %v2122_v45, 265  ;;  %296 = vbcast.lane.b32.xlu0 %v2122_v45, 257 }
  0x46   :  { %171 = vbcast.lane.b32.xlu1 %v2122_v45, 264  ;;  %167 = vbcast.lane.b32.xlu0 %v2122_v45, 256 }
  0x4a   :  { %516 = vbcast.lane.b32.xlu1 %v2094_v15, 267  ;;  %512 = vbcast.lane.b32.xlu0 %v2094_v15, 259 }
  0x4e   :  { %396 = vbcast.lane.b32.xlu1 %v2094_v15, 266  ;;  %392 = vbcast.lane.b32.xlu0 %v2094_v15, 258 }
  0x52   :  { %308 = vbcast.lane.b32.xlu1 %v2134_v50, 265  ;;  %304 = vbcast.lane.b32.xlu0 %v2134_v50, 257 }
  0x56   :  { %182 = vbcast.lane.b32.xlu1 %v2134_v50, 264  ;;  %178 = vbcast.lane.b32.xlu0 %v2134_v50, 256 }
  0x5a   :  { %524 = vbcast.lane.b32.xlu1 %v2102_v21, 267  ;;  %520 = vbcast.lane.b32.xlu0 %v2102_v21, 259 }
  0x5e   :  { %404 = vbcast.lane.b32.xlu1 %v2102_v21, 266  ;;  %400 = vbcast.lane.b32.xlu0 %v2102_v21, 258 }
  0x62   :  { %316 = vbcast.lane.b32.xlu1 %v2083_v8, 265  ;;  %312 = vbcast.lane.b32.xlu0 %v2083_v8, 257 }
  0x66   :  { %193 = vbcast.lane.b32.xlu1 %v2083_v8, 264  ;;  %189 = vbcast.lane.b32.xlu0 %v2083_v8, 256 }
  0x6a   :  { %532 = vbcast.lane.b32.xlu1 %v2110_v32, 267  ;;  %528 = vbcast.lane.b32.xlu0 %v2110_v32, 259 }
  0x6e   :  { %412 = vbcast.lane.b32.xlu1 %v2110_v32, 266  ;;  %408 = vbcast.lane.b32.xlu0 %v2110_v32, 258 }
  0x72   :  { %324 = vbcast.lane.b32.xlu1 %v2086_v9, 265  ;;  %320 = vbcast.lane.b32.xlu0 %v2086_v9, 257 }
  0x76   :  { %204 = vbcast.lane.b32.xlu1 %v2086_v9, 264  ;;  %200 = vbcast.lane.b32.xlu0 %v2086_v9, 256 }
  0x7a   :  { %540 = vbcast.lane.b32.xlu1 %v2122_v45, 267  ;;  %536 = vbcast.lane.b32.xlu0 %v2122_v45, 259 }
  0x7e   :  { %420 = vbcast.lane.b32.xlu1 %v2122_v45, 266  ;;  %416 = vbcast.lane.b32.xlu0 %v2122_v45, 258 }
  0x82   :  { %628 = vbcast.lane.b32.xlu1 %v2080_v6, 268  ;;  %624 = vbcast.lane.b32.xlu0 %v2080_v6, 260 }
  0x86   :  { %636 = vbcast.lane.b32.xlu1 %v2094_v15, 268  ;;  %632 = vbcast.lane.b32.xlu0 %v2094_v15, 260 }
  0x8a   :  { %548 = vbcast.lane.b32.xlu1 %v2134_v50, 267  ;;  %544 = vbcast.lane.b32.xlu0 %v2134_v50, 259 }
  0x8c   :  { %v124_v52 = vpop.permute.xlu1 %123  ;;  %v265_v53 = vpop.permute.xlu0 %264 }
  0x8d   :  { %vm206_vm0 = vcmp.eq.s32.totalorder %v124_v52, %v2167_v54  ;;  %vm326_vm3 = vcmp.eq.s32.totalorder %v265_v53, %v2167_v54 }
  0x8e   :  { %428 = vbcast.lane.b32.xlu1 %v2134_v50, 266  ;;  %424 = vbcast.lane.b32.xlu0 %v2134_v50, 258 }
  0x90   :  { %v128_v55 = vpop.permute.xlu1 %127  ;;  %v269_v56 = vpop.permute.xlu0 %268 }
  0x91   :  { %vm207_vm1 = vcmp.eq.s32.totalorder %v128_v55, %v2167_v54  ;;  %vm327_vm2 = vcmp.eq.s32.totalorder %v269_v56, %v2167_v54 }
  0x92   :  { %vm1650_vm4 = vmpackc.low %vm207_vm1, %vm206_vm0  ;;  %644 = vbcast.lane.b32.xlu1 %v2102_v21, 268  ;;  %640 = vbcast.lane.b32.xlu0 %v2102_v21, 260 }
  0x93   :  { %vm1648_vm5 = vmpackc.low %vm327_vm2, %vm326_vm3 }
  0x94   :  { %1649 = vmatprep.mubr.msk.bf16.mxu0 %vm1648_vm5, %v2023_v57  ;;  %v277_v58 = vpop.permute.xlu1 %276  ;;  %v273_v59 = vpop.permute.xlu0 %272 }
  0x95   :  { %vm329_vm6 = vcmp.eq.s32.totalorder %v277_v58, %v2167_v54  ;;  %1651 = vmatmul.mubr.msk.bf16.vlgmr.msra.gmra.mrb[0].mxu0 %vm1650_vm4, %v2023_v57  ;;  %vm328_vm7 = vcmp.eq.s32.totalorder %v273_v59, %v2167_v54 }
  0x96   :  { %vm1652_vm8 = vmpackc.low %vm329_vm6, %vm328_vm7  ;;  %652 = vbcast.lane.b32.xlu1 %v2110_v32, 268  ;;  %648 = vbcast.lane.b32.xlu0 %v2110_v32, 260 }
  0x97   :  { %1653 = vmatprep.mubr.msk.bf16.mxu0 %vm1652_vm8, %v2023_v57  ;;  %1891 = vmatpush3.bf16.msra.mxu0 %v1980_v51 }
  0x98   :  { %v139_v61 = vpop.permute.xlu1 %138  ;;  %v135_v62 = vpop.permute.xlu0 %134  ;;  %1892 = vmatprep.subr.bf16.mxu0 %v1981_v60 }
  0x99   :  { %vm209_vm9 = vcmp.eq.s32.totalorder %v139_v61, %v2167_v54  ;;  %vm208_vm10 = vcmp.eq.s32.totalorder %v135_v62, %v2167_v54 }
  0x9a   :  { %vm1654_vm11 = vmpackc.low %vm209_vm9, %vm208_vm10  ;;  %556 = vbcast.lane.b32.xlu1 %v2083_v8, 267  ;;  %552 = vbcast.lane.b32.xlu0 %v2083_v8, 259 }
  0x9b   :  { %1893 = vmatpush3.bf16.msra.mxu0 %v1981_v60 }
  0x9c   :  { %v285_v0 = vpop.permute.xlu1 %284  ;;  %v281_v1 = vpop.permute.xlu0 %280  ;;  %1894 = vmatprep.subr.bf16.mxu0 %v1982_v63 }
  0x9d   :  { %vm331_vm12 = vcmp.eq.s32.totalorder %v285_v0, %v2167_v54  ;;  %1655 = vmatmul.mubr.msk.bf16.gmra.mrb[4].mxu0 %vm1654_vm11, %v2023_v57  ;;  %vm330_vm13 = vcmp.eq.s32.totalorder %v281_v1, %v2167_v54 }
  0x9e   :  { %vm1656_vm14 = vmpackc.low %vm331_vm12, %vm330_vm13  ;;  %436 = vbcast.lane.b32.xlu1 %v2083_v8, 266  ;;  %432 = vbcast.lane.b32.xlu0 %v2083_v8, 258 }
  0x9f   :  { %1657 = vmatprep.mubr.msk.bf16.mxu0 %vm1656_vm14, %v2023_v57  ;;  %1895 = vmatpush3.bf16.msra.mxu0 %v1982_v63 }
  0xa0   :  { %v150_v3 = vpop.permute.xlu1 %149  ;;  %v146_v4 = vpop.permute.xlu0 %145  ;;  %1896 = vmatprep.subr.bf16.mxu0 %v1983_v2 }
  0xa1   :  { %vm211_vm15 = vcmp.eq.s32.totalorder %v150_v3, %v2167_v54  ;;  %vm210_vm0 = vcmp.eq.s32.totalorder %v146_v4, %v2167_v54 }
  0xa2   :  { %vm1658_vm1 = vmpackc.low %vm211_vm15, %vm210_vm0  ;;  %660 = vbcast.lane.b32.xlu1 %v2122_v45, 268  ;;  %656 = vbcast.lane.b32.xlu0 %v2122_v45, 260 }
  0xa3   :  { %1897 = vmatpush3.bf16.msra.mxu0 %v1983_v2 }
  0xa4   :  { %v293_v6 = vpop.permute.xlu1 %292  ;;  %v289_v7 = vpop.permute.xlu0 %288  ;;  %1898 = vmatprep.subr.bf16.mxu0 %v1984_v5 }
  0xa5   :  { %vm333_vm2 = vcmp.eq.s32.totalorder %v293_v6, %v2167_v54  ;;  %1659 = vmatmul.mubr.msk.bf16.gmra.mrb[8].mxu0 %vm1658_vm1, %v2023_v57  ;;  %vm332_vm3 = vcmp.eq.s32.totalorder %v289_v7, %v2167_v54 }
  0xa6   :  { %vm1660_vm4 = vmpackc.low %vm333_vm2, %vm332_vm3  ;;  %668 = vbcast.lane.b32.xlu1 %v2134_v50, 268  ;;  %664 = vbcast.lane.b32.xlu0 %v2134_v50, 260 }
  0xa7   :  { %1661 = vmatprep.mubr.msk.bf16.mxu0 %vm1660_vm4, %v2023_v57  ;;  %1899 = vmatpush3.bf16.msra.mxu0 %v1984_v5 }
  0xa8   :  { %v161_v11 = vpop.permute.xlu1 %160  ;;  %v157_v12 = vpop.permute.xlu0 %156  ;;  %1900 = vmatprep.subr.bf16.mxu0 %v1985_v10 }
  0xa9   :  { %vm213_vm5 = vcmp.eq.s32.totalorder %v161_v11, %v2167_v54  ;;  %vm212_vm6 = vcmp.eq.s32.totalorder %v157_v12, %v2167_v54 }
  0xaa   :  { %vm1662_vm7 = vmpackc.low %vm213_vm5, %vm212_vm6  ;;  %564 = vbcast.lane.b32.xlu1 %v2086_v9, 267  ;;  %560 = vbcast.lane.b32.xlu0 %v2086_v9, 259 }
  0xab   :  { %1901 = vmatpush3.bf16.msra.mxu0 %v1985_v10 }
  0xac   :  { %v509_v14 = vpop.permute.xlu1 %508  ;;  %v505_v15 = vpop.permute.xlu0 %504  ;;  %1902 = vmatprep.subr.bf16.mxu0 %v1986_v13 }
  0xad   :  { %vm567_vm8 = vcmp.eq.s32.totalorder %v509_v14, %v2167_v54  ;;  %1663 = vmatmul.mubr.msk.bf16.gmra.mrb[12].mxu0 %vm1662_vm7, %v2023_v57  ;;  %vm566_vm9 = vcmp.eq.s32.totalorder %v505_v15, %v2167_v54 }
  0xae   :  { %444 = vbcast.lane.b32.xlu1 %v2086_v9, 266  ;;  %440 = vbcast.lane.b32.xlu0 %v2086_v9, 258  ;;  %vm1680_vm10 = vmpackc.low %vm567_vm8, %vm566_vm9 }
  0xaf   :  { %1681 = vmatprep.mubr.msk.bf16.mxu1 %vm1680_vm10, %v2023_v57  ;;  %1903 = vmatpush3.bf16.msra.mxu0 %v1986_v13 }
  0xb0   :  { %v389_v17 = vpop.permute.xlu1 %388  ;;  %v385_v18 = vpop.permute.xlu0 %384  ;;  %1904 = vmatprep.subr.bf16.mxu0 %v1987_v16 }
  0xb1   :  { %vm447_vm11 = vcmp.eq.s32.totalorder %v389_v17, %v2167_v54  ;;  %vm446_vm12 = vcmp.eq.s32.totalorder %v385_v18, %v2167_v54 }
  0xb2   :  { %vm1682_vm13 = vmpackc.low %vm447_vm11, %vm446_vm12  ;;  %676 = vbcast.lane.b32.xlu1 %v2083_v8, 268  ;;  %672 = vbcast.lane.b32.xlu0 %v2083_v8, 260 }
  0xb3   :  { %1683 = vmatmul.mubr.msk.bf16.vlgmr.msra.gmra.mrb[0].mxu1 %vm1682_vm13, %v2023_v57  ;;  %1905 = vmatpush3.bf16.msra.mxu0 %v1987_v16 }
  0xb4   :  { %v301_v19 = vpop.permute.xlu1 %300  ;;  %v297_v20 = vpop.permute.xlu0 %296 }
  0xb5   :  { %vm335_vm14 = vcmp.eq.s32.totalorder %v301_v19, %v2167_v54  ;;  %vm334_vm15 = vcmp.eq.s32.totalorder %v297_v20, %v2167_v54 }
  0xb6   :  { %vm1664_vm0 = vmpackc.low %vm335_vm14, %vm334_vm15  ;;  %684 = vbcast.lane.b32.xlu1 %v2086_v9, 268  ;;  %680 = vbcast.lane.b32.xlu0 %v2086_v9, 260 }
  0xb7   :  { %1665 = vmatprep.mubr.msk.bf16.mxu0 %vm1664_vm0, %v2023_v57 }
  0xb8   :  { %v172_v21 = vpop.permute.xlu1 %171  ;;  %v168_v22 = vpop.permute.xlu0 %167 }
  0xb9   :  { %vm215_vm1 = vcmp.eq.s32.totalorder %v172_v21, %v2167_v54  ;;  %vm214_vm2 = vcmp.eq.s32.totalorder %v168_v22, %v2167_v54 }
  0xba   :  { %vm1666_vm3 = vmpackc.low %vm215_vm1, %vm214_vm2 }
  0xbb   :  { %1667 = vmatmul.mubr.msk.bf16.gmra.mrb[16].mxu0 %vm1666_vm3, %v2023_v57 }
  0xbc   :  { %v517_v8 = vpop.permute.xlu1 %516  ;;  %v513_v23 = vpop.permute.xlu0 %512 }
  0xbd   :  { %vm569_vm4 = vcmp.eq.s32.totalorder %v517_v8, %v2167_v54  ;;  %vm568_vm5 = vcmp.eq.s32.totalorder %v513_v23, %v2167_v54  ;;  %v2024_v8 = vmov 0.0  }
  0xbe   :  { %vm1684_vm6 = vmpackc.low %vm569_vm4, %vm568_vm5  ;;  %1922 = vmatprep.subr.bf16.mxu1 %v2024_v8 }
  0xbf   :  { %1685 = vmatprep.mubr.msk.bf16.mxu1 %vm1684_vm6, %v2023_v57 }
  0xc0   :  { %v397_v9 = vpop.permute.xlu1 %396  ;;  %v393_v24 = vpop.permute.xlu0 %392 }
  0xc1   :  { %vm449_vm7 = vcmp.eq.s32.totalorder %v397_v9, %v2167_v54  ;;  %vm448_vm8 = vcmp.eq.s32.totalorder %v393_v24, %v2167_v54 }
  0xc2   :  { %vm1686_vm9 = vmpackc.low %vm449_vm7, %vm448_vm8 }
  0xc3   :  { %1687 = vmatmul.mubr.msk.bf16.gmra.mrb[4].mxu1 %vm1686_vm9, %v2023_v57 }
  0xc4   :  { %v309_v25 = vpop.permute.xlu1 %308  ;;  %v305_v26 = vpop.permute.xlu0 %304 }
  0xc5   :  { %vm337_vm10 = vcmp.eq.s32.totalorder %v309_v25, %v2167_v54  ;;  %vm336_vm11 = vcmp.eq.s32.totalorder %v305_v26, %v2167_v54 }
  0xc6   :  { %vm1668_vm12 = vmpackc.low %vm337_vm10, %vm336_vm11 }
  0xc7   :  { %1669 = vmatprep.mubr.msk.bf16.mxu0 %vm1668_vm12, %v2023_v57 }
  0xc8   :  { %v183_v27 = vpop.permute.xlu1 %182  ;;  %v179_v28 = vpop.permute.xlu0 %178 }
  0xc9   :  { %vm217_vm13 = vcmp.eq.s32.totalorder %v183_v27, %v2167_v54  ;;  %vm216_vm14 = vcmp.eq.s32.totalorder %v179_v28, %v2167_v54 }
  0xca   :  { %vm1670_vm15 = vmpackc.low %vm217_vm13, %vm216_vm14 }
  0xcb   :  { %1671 = vmatmul.mubr.msk.bf16.gmra.mrb[20].mxu0 %vm1670_vm15, %v2023_v57 }
  0xcc   :  { %v525_v29 = vpop.permute.xlu1 %524  ;;  %v521_v30 = vpop.permute.xlu0 %520 }
  0xcd   :  { %vm571_vm0 = vcmp.eq.s32.totalorder %v525_v29, %v2167_v54  ;;  %vm570_vm1 = vcmp.eq.s32.totalorder %v521_v30, %v2167_v54 }
  0xce   :  { %vm1688_vm2 = vmpackc.low %vm571_vm0, %vm570_vm1 }
  0xcf   :  { %1689 = vmatprep.mubr.msk.bf16.mxu1 %vm1688_vm2, %v2023_v57 }
  0xd0   :  { %v405_v31 = vpop.permute.xlu1 %404  ;;  %v401_v32 = vpop.permute.xlu0 %400 }
  0xd1   :  { %vm451_vm3 = vcmp.eq.s32.totalorder %v405_v31, %v2167_v54  ;;  %vm450_vm4 = vcmp.eq.s32.totalorder %v401_v32, %v2167_v54 }
  0xd2   :  { %vm1690_vm5 = vmpackc.low %vm451_vm3, %vm450_vm4 }
  0xd3   :  { %1691 = vmatmul.mubr.msk.bf16.gmra.mrb[8].mxu1 %vm1690_vm5, %v2023_v57 }
  0xd4   :  { %v317_v33 = vpop.permute.xlu1 %316  ;;  %v313_v34 = vpop.permute.xlu0 %312 }
  0xd5   :  { %vm339_vm6 = vcmp.eq.s32.totalorder %v317_v33, %v2167_v54  ;;  %vm338_vm7 = vcmp.eq.s32.totalorder %v313_v34, %v2167_v54  ;;  %v1989_v33 = vld [vmem:[%s2433_s3 + $0x8] sm:$0xff]  }
  0xd6   :  { %vm1672_vm8 = vmpackc.low %vm339_vm6, %vm338_vm7 }
  0xd7   :  { %1673 = vmatprep.mubr.msk.bf16.mxu0 %vm1672_vm8, %v2023_v57 }
  0xd8   :  { %v194_v35 = vpop.permute.xlu1 %193  ;;  %v190_v36 = vpop.permute.xlu0 %189 }
  0xd9   :  { %vm219_vm9 = vcmp.eq.s32.totalorder %v194_v35, %v2167_v54  ;;  %vm218_vm10 = vcmp.eq.s32.totalorder %v190_v36, %v2167_v54 }
  0xda   :  { %vm1674_vm11 = vmpackc.low %vm219_vm9, %vm218_vm10 }
  0xdb   :  { %1675 = vmatmul.mubr.msk.bf16.gmra.mrb[24].mxu0 %vm1674_vm11, %v2023_v57 }
  0xdc   :  { %v533_v37 = vpop.permute.xlu1 %532  ;;  %v529_v38 = vpop.permute.xlu0 %528 }
  0xdd   :  { %vm573_vm12 = vcmp.eq.s32.totalorder %v533_v37, %v2167_v54  ;;  %vm572_vm13 = vcmp.eq.s32.totalorder %v529_v38, %v2167_v54 }
  0xde   :  { %vm1692_vm14 = vmpackc.low %vm573_vm12, %vm572_vm13 }
  0xdf   :  { %1693 = vmatprep.mubr.msk.bf16.mxu1 %vm1692_vm14, %v2023_v57 }
  0xe0   :  { %v413_v39 = vpop.permute.xlu1 %412  ;;  %v409_v40 = vpop.permute.xlu0 %408 }
  0xe1   :  { %vm453_vm15 = vcmp.eq.s32.totalorder %v413_v39, %v2167_v54  ;;  %vm452_vm0 = vcmp.eq.s32.totalorder %v409_v40, %v2167_v54 }
  0xe2   :  { %vm1694_vm1 = vmpackc.low %vm453_vm15, %vm452_vm0 }
  0xe3   :  { %1695 = vmatmul.mubr.msk.bf16.gmra.mrb[12].mxu1 %vm1694_vm1, %v2023_v57 }
  0xe4   :  { %v325_v41 = vpop.permute.xlu1 %324  ;;  %v321_v42 = vpop.permute.xlu0 %320 }
  0xe5   :  { %vm341_vm2 = vcmp.eq.s32.totalorder %v325_v41, %v2167_v54  ;;  %vm340_vm3 = vcmp.eq.s32.totalorder %v321_v42, %v2167_v54 }
  0xe6   :  { %vm1676_vm4 = vmpackc.low %vm341_vm2, %vm340_vm3 }
  0xe7   :  { %1677 = vmatprep.mubr.msk.bf16.mxu0 %vm1676_vm4, %v2023_v57 }
  0xe8   :  { %v205_v43 = vpop.permute.xlu1 %204  ;;  %v201_v44 = vpop.permute.xlu0 %200 }
  0xe9   :  { %vm221_vm5 = vcmp.eq.s32.totalorder %v205_v43, %v2167_v54  ;;  %vm220_vm6 = vcmp.eq.s32.totalorder %v201_v44, %v2167_v54  ;;  %v1990_v44 = vld [vmem:[%s2433_s3 + $0x10] sm:$0xff]  }
  0xea   :  { %vm1678_vm7 = vmpackc.low %vm221_vm5, %vm220_vm6 }
  0xeb   :  { %1679 = vmatmul.mubr.msk.bf16.gmra.mrb[28].mxu0 %vm1678_vm7, %v2023_v57 }
  0xec   :  { %v541_v45 = vpop.permute.xlu1 %540  ;;  %v537_v46 = vpop.permute.xlu0 %536 }
  0xed   :  { %vm575_vm8 = vcmp.eq.s32.totalorder %v541_v45, %v2167_v54  ;;  %vm574_vm9 = vcmp.eq.s32.totalorder %v537_v46, %v2167_v54 }
  0xee   :  { %vm1696_vm10 = vmpackc.low %vm575_vm8, %vm574_vm9 }
  0xef   :  { %1697 = vmatprep.mubr.msk.bf16.mxu1 %vm1696_vm10, %v2023_v57 }
  0xf0   :  { %v421_v47 = vpop.permute.xlu1 %420  ;;  %v417_v48 = vpop.permute.xlu0 %416 }
  0xf1   :  { %vm455_vm11 = vcmp.eq.s32.totalorder %v421_v47, %v2167_v54  ;;  %vm454_vm12 = vcmp.eq.s32.totalorder %v417_v48, %v2167_v54 }
  0xf2   :  { %vm1698_vm13 = vmpackc.low %vm455_vm11, %vm454_vm12 }
  0xf3   :  { %1699 = vmatmul.mubr.msk.bf16.gmra.mrb[16].mxu1 %vm1698_vm13, %v2023_v57 }
  0xf4   :  { %v629_v49 = vpop.permute.xlu1 %628  ;;  %v625_v50 = vpop.permute.xlu0 %624 }
  0xf5   :  { %vm687_vm14 = vcmp.eq.s32.totalorder %v629_v49, %v2167_v54  ;;  %vm686_vm15 = vcmp.eq.s32.totalorder %v625_v50, %v2167_v54  ;;  %v1991_v49 = vld [vmem:[%s2433_s3 + $0x18] sm:$0xff]  }
  0xf6   :  { %vm1712_vm0 = vmpackc.low %vm687_vm14, %vm686_vm15 }
  0xf7   :  { %1906 = vmatprep.mubr.msk.bf16.mxu0 %vm1712_vm0, %v2023_v57 }
  0xf8   :  { %v637_v51 = vpop.permute.xlu1 %636  ;;  %v633_v52 = vpop.permute.xlu0 %632 }
  0xf9   :  { %vm689_vm1 = vcmp.eq.s32.totalorder %v637_v51, %v2167_v54  ;;  %vm688_vm2 = vcmp.eq.s32.totalorder %v633_v52, %v2167_v54 }
  0xfa   :  { %vm1714_vm3 = vmpackc.low %vm689_vm1, %vm688_vm2 }
  0xfb   :  { %1907 = vmatmul.mubr.msk.bf16.vlgmr.msra.gmra.mrb[32].mxu0 %vm1714_vm3, %v2023_v57 }
  0xfc   :  { %v549_v53 = vpop.permute.xlu1 %548  ;;  %v545_v55 = vpop.permute.xlu0 %544 }
  0xfd   :  { %vm577_vm4 = vcmp.eq.s32.totalorder %v549_v53, %v2167_v54  ;;  %vm576_vm5 = vcmp.eq.s32.totalorder %v545_v55, %v2167_v54  ;;  %v1992_v55 = vld [vmem:[%s2433_s3 + $0x20] sm:$0xff]  }
  0xfe   :  { %vm1700_vm6 = vmpackc.low %vm577_vm4, %vm576_vm5 }
  0xff   :  { %1701 = vmatprep.mubr.msk.bf16.mxu1 %vm1700_vm6, %v2023_v57 }
 0x100   :  { %v429_v56 = vpop.permute.xlu1 %428  ;;  %v425_v58 = vpop.permute.xlu0 %424 }
 0x101   :  { %vm457_vm7 = vcmp.eq.s32.totalorder %v429_v56, %v2167_v54  ;;  %vm456_vm8 = vcmp.eq.s32.totalorder %v425_v58, %v2167_v54 }
 0x102   :  { %vm1702_vm9 = vmpackc.low %vm457_vm7, %vm456_vm8 }
 0x103   :  { %1703 = vmatmul.mubr.msk.bf16.gmra.mrb[20].mxu1 %vm1702_vm9, %v2023_v57 }
 0x104   :  { %v645_v59 = vpop.permute.xlu1 %644  ;;  %v641_v60 = vpop.permute.xlu0 %640 }
 0x105   :  { %vm691_vm10 = vcmp.eq.s32.totalorder %v645_v59, %v2167_v54  ;;  %vm690_vm11 = vcmp.eq.s32.totalorder %v641_v60, %v2167_v54  ;;  %v1993_v59 = vld [vmem:[%s2433_s3 + $0x28] sm:$0xff]  }
 0x106   :  { %vm1716_vm12 = vmpackc.low %vm691_vm10, %vm690_vm11 }
 0x107   :  { %1910 = vmatprep.mubr.msk.bf16.mxu0 %vm1716_vm12, %v2023_v57 }
 0x108   :  { %v653_v61 = vpop.permute.xlu1 %652  ;;  %v649_v62 = vpop.permute.xlu0 %648 }
 0x109   :  { %vm693_vm13 = vcmp.eq.s32.totalorder %v653_v61, %v2167_v54  ;;  %vm692_vm14 = vcmp.eq.s32.totalorder %v649_v62, %v2167_v54 }
 0x10a   :  { %vm1718_vm15 = vmpackc.low %vm693_vm13, %vm692_vm14 }
 0x10b   :  { %1911 = vmatmul.mubr.msk.bf16.gmra.mrb[36].mxu0 %vm1718_vm15, %v2023_v57 }
 0x10c   :  { %v557_v63 = vpop.permute.xlu1 %556  ;;  %v553_v0 = vpop.permute.xlu0 %552 }
 0x10d   :  { %vm579_vm0 = vcmp.eq.s32.totalorder %v557_v63, %v2167_v54  ;;  %vm578_vm1 = vcmp.eq.s32.totalorder %v553_v0, %v2167_v54  ;;  %v1994_v0 = vld [vmem:[%s2433_s3 + $0x30] sm:$0xff]  }
 0x10e   :  { %vm1704_vm2 = vmpackc.low %vm579_vm0, %vm578_vm1 }
 0x10f   :  { %1705 = vmatprep.mubr.msk.bf16.mxu1 %vm1704_vm2, %v2023_v57 }
 0x110   :  { %v437_v1 = vpop.permute.xlu1 %436  ;;  %v433_v2 = vpop.permute.xlu0 %432 }
 0x111   :  { %vm459_vm3 = vcmp.eq.s32.totalorder %v437_v1, %v2167_v54  ;;  %vm458_vm4 = vcmp.eq.s32.totalorder %v433_v2, %v2167_v54 }
 0x112   :  { %vm1706_vm5 = vmpackc.low %vm459_vm3, %vm458_vm4 }
 0x113   :  { %1707 = vmatmul.mubr.msk.bf16.gmra.mrb[24].mxu1 %vm1706_vm5, %v2023_v57 }
 0x114   :  { %v661_v3 = vpop.permute.xlu1 %660  ;;  %v657_v4 = vpop.permute.xlu0 %656 }
 0x115   :  { %vm695_vm6 = vcmp.eq.s32.totalorder %v661_v3, %v2167_v54  ;;  %vm694_vm7 = vcmp.eq.s32.totalorder %v657_v4, %v2167_v54  ;;  %v1995_v4 = vld [vmem:[%s2433_s3 + $0x38] sm:$0xff]  }
 0x116   :  { %vm1720_vm8 = vmpackc.low %vm695_vm6, %vm694_vm7 }
 0x117   :  { %1914 = vmatprep.mubr.msk.bf16.mxu0 %vm1720_vm8, %v2023_v57  ;;  %vm2025_vm8 = vmmov 0  }
 0x118   :  { %v669_v5 = vpop.permute.xlu1 %668  ;;  %v665_v6 = vpop.permute.xlu0 %664 }
 0x119   :  { %vm697_vm9 = vcmp.eq.s32.totalorder %v669_v5, %v2167_v54  ;;  %vm696_vm10 = vcmp.eq.s32.totalorder %v665_v6, %v2167_v54 }
 0x11a   :  { %vm1722_vm11 = vmpackc.low %vm697_vm9, %vm696_vm10  ;;  %vm1418_vm9 = vcmask 1041409   ;;  %vm1420_vm10 = vcmask 1042434  }
 0x11b   :  { %1915 = vmatmul.mubr.msk.bf16.gmra.mrb[40].mxu0 %vm1722_vm11, %v2023_v57  ;;  %vm1422_vm11 = vcmask 1043459  }
 0x11c   :  { %v565_v7 = vpop.permute.xlu1 %564  ;;  %v561_v10 = vpop.permute.xlu0 %560 }
 0x11d   :  { %vm581_vm12 = vcmp.eq.s32.totalorder %v565_v7, %v2167_v54  ;;  %vm580_vm13 = vcmp.eq.s32.totalorder %v561_v10, %v2167_v54 }
 0x11e   :  { %vm1708_vm14 = vmpackc.low %vm581_vm12, %vm580_vm13  ;;  %vm1424_vm12 = vcmask 1044484   ;;  %vm1426_vm13 = vcmask 1045509  }
 0x11f   :  { %1709 = vmatprep.mubr.msk.bf16.mxu1 %vm1708_vm14, %v2023_v57  ;;  %vm1428_vm14 = vcmask 1046534  }
 0x120   :  { %v445_v11 = vpop.permute.xlu1 %444  ;;  %v441_v12 = vpop.permute.xlu0 %440 }
 0x121   :  { %vm461_vm15 = vcmp.eq.s32.totalorder %v445_v11, %v2167_v54  ;;  %vm460_vm0 = vcmp.eq.s32.totalorder %v441_v12, %v2167_v54 }
 0x122   :  { %vm1710_vm1 = vmpackc.low %vm461_vm15, %vm460_vm0  ;;  %vm1430_vm15 = vcmask 1047559  }
 0x123   :  { %1711 = vmatmul.mubr.msk.bf16.gmra.mrb[28].mxu1 %vm1710_vm1, %v2023_v57 }
 0x124   :  { %v677_v13 = vpop.permute.xlu1 %676  ;;  %v673_v14 = vpop.permute.xlu0 %672  ;;  %1938 = vmatprep.mubr.msk.bf16.mxu1 %vm2025_vm8, %v2024_v8 }
 0x125   :  { %vm699_vm2 = vcmp.eq.s32.totalorder %v677_v13, %v2167_v54  ;;  %vm698_vm3 = vcmp.eq.s32.totalorder %v673_v14, %v2167_v54 }
 0x126   :  { %vm1724_vm4 = vmpackc.low %vm699_vm2, %vm698_vm3 }
 0x127   :  { %1918 = vmatprep.mubr.msk.bf16.mxu0 %vm1724_vm4, %v2023_v57 }
 0x128   :  { %v685_v15 = vpop.permute.xlu1 %684  ;;  %v681_v16 = vpop.permute.xlu0 %680 }
 0x129   :  { %vm701_vm5 = vcmp.eq.s32.totalorder %v685_v15, %v2167_v54  ;;  %vm700_vm6 = vcmp.eq.s32.totalorder %v681_v16, %v2167_v54 }
 0x12a   :  { %vm1726_vm7 = vmpackc.low %vm701_vm5, %vm700_vm6 }
 0x12b   :  { %1919 = vmatmul.mubr.msk.bf16.gmra.mrb[44].mxu0 %vm1726_vm7, %v2023_v57  ;;  %v1988_v57 = vld [vmem:[%s2433_s3] sm:$0xff]  }
 0x12c   :  { %1923 = vmatpush3.bf16.msra.mxu1 %v1988_v57 }
 0x12d   :  { %1924 = vmatprep.subr.bf16.mxu1 %v2024_v8 }
 0x130   :  { %1925 = vmatpush3.bf16.msra.mxu1 %v1989_v33 }
 0x131   :  { %1926 = vmatprep.subr.bf16.mxu1 %v2024_v8 }
 0x134   :  { %1927 = vmatpush3.bf16.msra.mxu1 %v1990_v44 }
 0x135   :  { %1928 = vmatprep.subr.bf16.mxu1 %v2024_v8 }
 0x138   :  { %1929 = vmatpush3.bf16.msra.mxu1 %v1991_v49 }
 0x139   :  { %1930 = vmatprep.subr.bf16.mxu1 %v2024_v8 }
 0x13c   :  { %1931 = vmatpush3.bf16.msra.mxu1 %v1992_v55 }
 0x13d   :  { %1932 = vmatprep.subr.bf16.mxu1 %v2024_v8 }
 0x140   :  { %1933 = vmatpush3.bf16.msra.mxu1 %v1993_v59 }
 0x141   :  { %1934 = vmatprep.subr.bf16.mxu1 %v2024_v8 }
 0x144   :  { %1935 = vmatpush3.bf16.msra.mxu1 %v1994_v0 }
 0x145   :  { %1936 = vmatprep.subr.bf16.mxu1 %v2024_v8 }
 0x148   :  { %1937 = vmatpush3.bf16.msra.mxu1 %v1995_v4 }
 0x168   :  { %v1753_v17 = vpop.f32.mrb[0].mxu0 }
 0x169   :  { %v1754_v18 = vpop.f32.mrb[1].mxu0 }
 0x16a   :  { %v1755_v19 = vadd.f32 %v1754_v18, %v1753_v17  ;;  %v1756_v20 = vpop.f32.mrb[2].mxu0 }
 0x16b   :  { %v1757_v21 = vpop.f32.mrb[3].mxu0 }
 0x16c   :  { %v1758_v22 = vadd.f32 %v1757_v21, %v1756_v20 }
 0x170   :  { %v1759_v23 = vpop.f32.mrb[4].mxu0 }
 0x171   :  { %v1760_v9 = vpop.f32.mrb[5].mxu0 }
 0x172   :  { %v1761_v24 = vadd.f32 %v1760_v9, %v1759_v23  ;;  %v1762_v25 = vpop.f32.mrb[6].mxu0 }
 0x173   :  { %v1763_v26 = vpop.f32.mrb[7].mxu0 }
 0x174   :  { %v1764_v27 = vadd.f32 %v1763_v26, %v1762_v25 }
 0x178   :  { %v1765_v28 = vpop.f32.mrb[8].mxu0 }
 0x179   :  { %v1766_v54 = vpop.f32.mrb[9].mxu0 }
 0x17a   :  { %v2315_v29 = vadd.f32 %v1766_v54, %v1765_v28  ;;  %v1768_v30 = vpop.f32.mrb[10].mxu0 }
 0x17b   :  { %v1769_v31 = vpop.f32.mrb[11].mxu0 }
 0x17c   :  { %v2317_v32 = vadd.f32 %v1769_v31, %v1768_v30 }
 0x180   :  { %v1771_v34 = vpop.f32.mrb[12].mxu0 }
 0x181   :  { %v1772_v35 = vpop.f32.mrb[13].mxu0 }
 0x182   :  { %v2324_v36 = vadd.f32 %v1772_v35, %v1771_v34  ;;  %v1774_v37 = vpop.f32.mrb[14].mxu0 }
 0x183   :  { %v1775_v38 = vpop.f32.mrb[15].mxu0 }
 0x184   :  { %v2326_v39 = vadd.f32 %v1775_v38, %v1774_v37 }
 0x186   :  { %v1817_v40 = vpop.f32.mrb[0].mxu1 }
 0x187   :  { %v1818_v41 = vpop.f32.mrb[1].mxu1 }
 0x188   :  { %v1819_v42 = vadd.f32 %v1818_v41, %v1817_v40  ;;  %v1820_v43 = vpop.f32.mrb[2].mxu1 }
 0x189   :  { %v1821_v45 = vpop.f32.mrb[3].mxu1 }
 0x18a   :  { %v1822_v46 = vadd.f32 %v1821_v45, %v1820_v43  ;;  %v2331_v47 = vadd.f32 %v1819_v42, %v1755_v19 }
 0x18c   :  { %v2334_v48 = vadd.f32 %v1822_v46, %v1758_v22 }
 0x18e   :  { %v1777_v50 = vpop.f32.mrb[16].mxu0 }
 0x18f   :  { %v1778_v51 = vpop.f32.mrb[17].mxu0 }
 0x190   :  { %v2340_v52 = vadd.f32 %v1778_v51, %v1777_v50  ;;  %v1780_v53 = vpop.f32.mrb[18].mxu0 }
 0x191   :  { %v1781_v56 = vpop.f32.mrb[19].mxu0 }
 0x192   :  { %v1782_v58 = vadd.f32 %v1781_v56, %v1780_v53 }
 0x196   :  { %v1823_v60 = vpop.f32.mrb[4].mxu1 }
 0x197   :  { %v1824_v61 = vpop.f32.mrb[5].mxu1 }
 0x198   :  { %v1825_v62 = vadd.f32 %v1824_v61, %v1823_v60  ;;  %v1826_v63 = vpop.f32.mrb[6].mxu1  ;;  %v2387_v60 = vld [vmem:[%s2432_s2] sm:$0xff] }
 0x199   :  { %v1827_v1 = vpop.f32.mrb[7].mxu1 }
 0x19a   :  { %v1828_v2 = vadd.f32 %v1827_v1, %v1826_v63  ;;  %v1122_v3 = vadd.f32 %v1825_v62, %v1761_v24 }
 0x19c   :  { %v1125_v5 = vadd.f32 %v1828_v2, %v1764_v27 }
 0x19e   :  { %v1783_v6 = vpop.f32.mrb[20].mxu0 }
 0x19f   :  { %v1784_v7 = vpop.f32.mrb[21].mxu0 }
 0x1a0   :  { %v2358_v10 = vadd.f32 %v1784_v7, %v1783_v6  ;;  %v1786_v11 = vpop.f32.mrb[22].mxu0 }
 0x1a1   :  { %v1787_v12 = vpop.f32.mrb[23].mxu0 }
 0x1a2   :  { %v2360_v13 = vadd.f32 %v1787_v12, %v1786_v11 }
 0x1a6   :  { %v1829_v14 = vpop.f32.mrb[8].mxu1 }
 0x1a7   :  { %v1830_v15 = vpop.f32.mrb[9].mxu1 }
 0x1a8   :  { %v1831_v16 = vadd.f32 %v1830_v15, %v1829_v14  ;;  %v1832_v17 = vpop.f32.mrb[10].mxu1 }
 0x1a9   :  { %v1833_v18 = vpop.f32.mrb[11].mxu1 }
 0x1aa   :  { %v1834_v19 = vadd.f32 %v1833_v18, %v1832_v17  ;;  %v2363_v20 = vadd.f32 %v1831_v16, %v2315_v29 }
 0x1ac   :  { %v2366_v21 = vadd.f32 %v1834_v19, %v2317_v32 }
 0x1ae   :  { %v1789_v22 = vpop.f32.mrb[24].mxu0 }
 0x1af   :  { %v1790_v8 = vpop.f32.mrb[25].mxu0 }
 0x1b0   :  { %v2368_v23 = vadd.f32 %v1790_v8, %v1789_v22  ;;  %v1792_v9 = vpop.f32.mrb[26].mxu0 }
 0x1b1   :  { %v1793_v24 = vpop.f32.mrb[27].mxu0 }
 0x1b2   :  { %v2370_v25 = vadd.f32 %v1793_v24, %v1792_v9 }
 0x1b6   :  { %v1835_v26 = vpop.f32.mrb[12].mxu1 }
 0x1b7   :  { %v1836_v27 = vpop.f32.mrb[13].mxu1 }
 0x1b8   :  { %v1837_v28 = vadd.f32 %v1836_v27, %v1835_v26  ;;  %v1838_v54 = vpop.f32.mrb[14].mxu1 }
 0x1b9   :  { %v1839_v57 = vpop.f32.mrb[15].mxu1 }
 0x1ba   :  { %v1840_v30 = vadd.f32 %v1839_v57, %v1838_v54  ;;  %v1138_v29 = vadd.f32 %v1837_v28, %v2324_v36 }
 0x1bc   :  { %v1141_v31 = vadd.f32 %v1840_v30, %v2326_v39 }
 0x1be   :  { %v1795_v32 = vpop.f32.mrb[28].mxu0 }
 0x1bf   :  { %v1796_v33 = vpop.f32.mrb[29].mxu0 }
 0x1c0   :  { %v2374_v34 = vadd.f32 %v1796_v33, %v1795_v32  ;;  %v1798_v35 = vpop.f32.mrb[30].mxu0 }
 0x1c1   :  { %v1799_v37 = vpop.f32.mrb[31].mxu0 }
 0x1c2   :  { %v2376_v38 = vadd.f32 %v1799_v37, %v1798_v35 }
 0x1c6   :  { %v1841_v40 = vpop.f32.mrb[16].mxu1 }
 0x1c7   :  { %v1842_v41 = vpop.f32.mrb[17].mxu1 }
 0x1c8   :  { %v1843_v42 = vadd.f32 %v1842_v41, %v1841_v40  ;;  %v1844_v43 = vpop.f32.mrb[18].mxu1 }
 0x1c9   :  { %v1845_v44 = vpop.f32.mrb[19].mxu1 }
 0x1ca   :  { %v1846_v45 = vadd.f32 %v1845_v44, %v1844_v43  ;;  %v2379_v46 = vadd.f32 %v1843_v42, %v2340_v52  ;;  %v2392_v52 = vld [vmem:[%s2432_s2 + $0x8] sm:$0xff] }
 0x1cc   :  { %v2381_v36 = vadd.f32 %v1846_v45, %v1782_v58 }
 0x1ce   :  { %v1908_v39 = vpop.f32.mrb[32].mxu0 }
 0x1cf   :  { %v1219_v49 = vadd.f32 %v1908_v39, %v1122_v3  ;;  %v1210_v50 = vpop.f32.mrb[33].mxu0 }
 0x1d0   :  { %v1211_v51 = vadd.f32 %v1210_v50, %v2331_v47  ;;  %v1909_v53 = vpop.f32.mrb[34].mxu0 }
 0x1d1   :  { %v1275_v55 = vmax.f32 %v1219_v49, 0.0  ;;  %v1222_v56 = vadd.f32 %v1909_v53, %v1125_v5  ;;  %v1213_v59 = vpop.f32.mrb[35].mxu0 }
 0x1d2   :  { %v1273_v61 = vmax.f32 %v1211_v51, 0.0  ;;  %v1214_v58 = vadd.f32 %v1213_v59, %v2334_v48 }
 0x1d3   :  { %v1276_v62 = vmax.f32 %v1222_v56, 0.0  ;;  %v1293_v47 = vmul.f32 %v2387_v60, %v1275_v55 }
 0x1d4   :  { %v1274_v63 = vmax.f32 %v1214_v58, 0.0  ;;  %v1291_v1 = vmul.f32 %v2387_v60, %v1273_v61 }
 0x1d5   :  { %v1294_v0 = vmul.f32 %v2392_v52, %v1276_v62 }
 0x1d6   :  { %v1292_v2 = vmul.f32 %v2392_v52, %v1274_v63  ;;  %v1847_v3 = vpop.f32.mrb[20].mxu1 }
 0x1d7   :  { %v1314_v4 = vmax.f32 %v1293_v47, %v1294_v0  ;;  %v1848_v5 = vpop.f32.mrb[21].mxu1 }
 0x1d8   :  { %v1307_v6 = vmax.f32 %v1291_v1, %v1292_v2  ;;  %v1849_v7 = vadd.f32 %v1848_v5, %v1847_v3  ;;  %v1850_v11 = vpop.f32.mrb[22].mxu1 }
 0x1d9   :  { %v1315_v12 = vrot.slane %v1314_v4, 4  ;;  %v1851_v14 = vpop.f32.mrb[23].mxu1 }
 0x1da   :  { %v1308_v15 = vrot.slane %v1307_v6, 4  ;;  %v1852_v48 = vadd.f32 %v1851_v14, %v1850_v11  ;;  %v1154_v16 = vadd.f32 %v1849_v7, %v2358_v10 }
 0x1db   :  { %v1316_v17 = vmax.f32 %v1314_v4, %v1315_v12 }
 0x1dc   :  { %v1309_v18 = vmax.f32 %v1307_v6, %v1308_v15  ;;  %v1157_v19 = vadd.f32 %v1852_v48, %v2360_v13 }
 0x1dd   :  { %v1317_v22 = vrot.slane %v1316_v17, 2 }
 0x1de   :  { %v1310_v8 = vrot.slane %v1309_v18, 2  ;;  %v1912_v9 = vpop.f32.mrb[36].mxu0 }
 0x1df   :  { %v1318_v24 = vmax.f32 %v1316_v17, %v1317_v22  ;;  %v1235_v26 = vadd.f32 %v1912_v9, %v1138_v29  ;;  %v1226_v27 = vpop.f32.mrb[37].mxu0 }
 0x1e0   :  { %v1311_v28 = vmax.f32 %v1309_v18, %v1310_v8  ;;  %v1227_v54 = vadd.f32 %v1226_v27, %v2363_v20  ;;  %v1913_v57 = vpop.f32.mrb[38].mxu0 }
 0x1e1   :  { %v1319_v30 = vrot.slane %v1318_v24, 1  ;;  %v1279_v32 = vmax.f32 %v1235_v26, 0.0  ;;  %v1238_v33 = vadd.f32 %v1913_v57, %v1141_v31  ;;  %v1229_v35 = vpop.f32.mrb[39].mxu0 }
 0x1e2   :  { %v1312_v37 = vrot.slane %v1311_v28, 1  ;;  %v1277_v10 = vmax.f32 %v1227_v54, 0.0  ;;  %v1230_v40 = vadd.f32 %v1229_v35, %v2366_v21 }
 0x1e3   :  { %v1320_v41 = vmax.f32 %v1318_v24, %v1319_v30  ;;  %v1280_v13 = vmax.f32 %v1238_v33, 0.0  ;;  %v1297_v29 = vmul.f32 %v2387_v60, %v1279_v32 }
 0x1e4   :  { %v1313_v42 = vmax.f32 %v1311_v28, %v1312_v37  ;;  %v1278_v43 = vmax.f32 %v1230_v40, 0.0  ;;  %v1295_v20 = vmul.f32 %v2387_v60, %v1277_v10 }
 0x1e5   :  { %v1364_v44 = vmax.f32 %v1320_v41, 0.0  ;;  %v1298_v45 = vmul.f32 %v2392_v52, %v1280_v13 }
 0x1e6   :  { %v1363_v39 = vmax.f32 %v1313_v42, 0.0  ;;  %v1296_v49 = vmul.f32 %v2392_v52, %v1278_v43  ;;  %v1853_v31 = vpop.f32.mrb[24].mxu1 }
 0x1e7   :  { %v1372_v50 = vpack.c.bf16 %v1364_v44, %v1364_v44  ;;  %v1328_v51 = vmax.f32 %v1297_v29, %v1298_v45  ;;  %v1854_v53 = vpop.f32.mrb[25].mxu1 }
 0x1e8   :  { %v1371_v55 = vpack.c.bf16 %v1363_v39, %v1363_v39  ;;  %v1321_v21 = vmax.f32 %v1295_v20, %v1296_v49  ;;  %v1855_v56 = vadd.f32 %v1854_v53, %v1853_v31  ;;  %v1856_v59 = vpop.f32.mrb[26].mxu1 }
 0x1e9   :  { %v1411_v61 = vunpack.c.l.b16 %v1372_v50  ;;  %v1329_v58 = vrot.slane %v1328_v51, 4  ;;  %v1857_v62 = vpop.f32.mrb[27].mxu1 }
 0x1ea   :  { %v1410_v63 = vunpack.c.l.b16 %v1371_v55  ;;  %v1322_v47 = vrot.slane %v1321_v21, 4  ;;  %v1858_v0 = vadd.f32 %v1857_v62, %v1856_v59  ;;  %v1162_v1 = vadd.f32 %v1855_v56, %v2368_v23 }
 0x1eb   :  { %v1330_v2 = vmax.f32 %v1328_v51, %v1329_v58 }
 0x1ec   :  { %v1419_v3 = vsel %vm1418_vm9, %v1411_v61, %v1410_v63  ;;  %v1323_v4 = vmax.f32 %v1321_v21, %v1322_v47  ;;  %v2409_v5 = vadd.f32 %v1858_v0, %v2370_v25 }
 0x1ed   :  { %v1331_v6 = vrot.slane %v1330_v2, 2 }
 0x1ee   :  { %v1324_v7 = vrot.slane %v1323_v4, 2  ;;  %v1916_v11 = vpop.f32.mrb[40].mxu0 }
 0x1ef   :  { %v1332_v12 = vmax.f32 %v1330_v2, %v1331_v6  ;;  %v1251_v14 = vadd.f32 %v1916_v11, %v1154_v16  ;;  %v1242_v15 = vpop.f32.mrb[41].mxu0 }
 0x1f0   :  { %v1325_v48 = vmax.f32 %v1323_v4, %v1324_v7  ;;  %v1243_v17 = vadd.f32 %v1242_v15, %v2379_v46  ;;  %v1917_v18 = vpop.f32.mrb[42].mxu0 }
 0x1f1   :  { %v1333_v22 = vrot.slane %v1332_v12, 1  ;;  %v1283_v8 = vmax.f32 %v1251_v14, 0.0  ;;  %v1254_v9 = vadd.f32 %v1917_v18, %v1157_v19  ;;  %v1245_v23 = vpop.f32.mrb[43].mxu0 }
 0x1f2   :  { %v1326_v24 = vrot.slane %v1325_v48, 1  ;;  %v1281_v26 = vmax.f32 %v1243_v17, 0.0  ;;  %v1246_v27 = vadd.f32 %v1245_v23, %v2381_v36 }
 0x1f3   :  { %v1334_v25 = vmax.f32 %v1332_v12, %v1333_v22  ;;  %v1284_v28 = vmax.f32 %v1254_v9, 0.0  ;;  %v1301_v16 = vmul.f32 %v2387_v60, %v1283_v8 }
 0x1f4   :  { %v1327_v54 = vmax.f32 %v1325_v48, %v1326_v24  ;;  %v1282_v57 = vmax.f32 %v1246_v27, 0.0  ;;  %v1299_v46 = vmul.f32 %v2387_v60, %v1281_v26 }
 0x1f5   :  { %v1366_v30 = vmax.f32 %v1334_v25, 0.0  ;;  %v1302_v32 = vmul.f32 %v2392_v52, %v1284_v28 }
 0x1f6   :  { %v1365_v33 = vmax.f32 %v1327_v54, 0.0  ;;  %v1300_v35 = vmul.f32 %v2392_v52, %v1282_v57  ;;  %v1859_v19 = vpop.f32.mrb[28].mxu1 }
 0x1f7   :  { %v1374_v37 = vpack.c.bf16 %v1366_v30, %v1366_v30  ;;  %v1342_v10 = vmax.f32 %v1301_v16, %v1302_v32  ;;  %v1860_v40 = vpop.f32.mrb[29].mxu1 }
 0x1f8   :  { %v1373_v41 = vpack.c.bf16 %v1365_v33, %v1365_v33  ;;  %v1335_v36 = vmax.f32 %v1299_v46, %v1300_v35  ;;  %v1861_v13 = vadd.f32 %v1860_v40, %v1859_v19  ;;  %v1862_v42 = vpop.f32.mrb[30].mxu1 }
 0x1f9   :  { %v1343_v43 = vrot.slane %v1342_v10, 4  ;;  %v1863_v44 = vpop.f32.mrb[31].mxu1  ;;  %v1413_v49 = vunpack.c.l.b16 %v1374_v37 }
 0x1fa   :  { %v1412_v29 = vunpack.c.l.b16 %v1373_v41  ;;  %v1336_v45 = vrot.slane %v1335_v36, 4  ;;  %v1864_v39 = vadd.f32 %v1863_v44, %v1862_v42  ;;  %v1170_v20 = vadd.f32 %v1861_v13, %v2374_v34 }
 0x1fb   :  { %v1344_v31 = vmax.f32 %v1342_v10, %v1343_v43 }
 0x1fc   :  { %v1421_v50 = vsel %vm1420_vm10, %v1412_v29, %v1419_v3  ;;  %v1337_v51 = vmax.f32 %v1335_v36, %v1336_v45  ;;  %v1173_v53 = vadd.f32 %v1864_v39, %v2376_v38  ;;  %v1728_v45 = vld [vmem:[%s2434_s4] ss:$0 sm:$0xff] }
 0x1fd   :  { %v1345_v55 = vrot.slane %v1344_v31, 2  ;;  %v1423_v21 = vsel %vm1422_vm11, %v1413_v49, %v1421_v50 }
 0x1fe   :  { %v1338_v56 = vrot.slane %v1337_v51, 2  ;;  %v1920_v59 = vpop.f32.mrb[44].mxu0 }
 0x1ff   :  { %v1346_v61 = vmax.f32 %v1344_v31, %v1345_v55  ;;  %v1267_v58 = vadd.f32 %v1920_v59, %v1170_v20  ;;  %v1258_v62 = vpop.f32.mrb[45].mxu0 }
 0x200   :  { %v1339_v63 = vmax.f32 %v1337_v51, %v1338_v56  ;;  %v1259_v47 = vadd.f32 %v1258_v62, %v1162_v1  ;;  %v1921_v0 = vpop.f32.mrb[46].mxu0 }
 0x201   :  { %v1347_v2 = vrot.slane %v1346_v61, 1  ;;  %v1287_v4 = vmax.f32 %v1267_v58, 0.0  ;;  %v1270_v6 = vadd.f32 %v1921_v0, %v1173_v53  ;;  %v1261_v34 = vpop.f32.mrb[47].mxu0 }
 0x202   :  { %v1340_v7 = vrot.slane %v1339_v63, 1  ;;  %v1285_v11 = vmax.f32 %v1259_v47, 0.0  ;;  %v1262_v3 = vadd.f32 %v1261_v34, %v2409_v5 }
 0x203   :  { %v1348_v12 = vmax.f32 %v1346_v61, %v1347_v2  ;;  %v1288_v38 = vmax.f32 %v1270_v6, 0.0  ;;  %v1305_v17 = vmul.f32 %v2387_v60, %v1287_v4 }
 0x204   :  { %v1341_v14 = vmax.f32 %v1339_v63, %v1340_v7  ;;  %v1286_v15 = vmax.f32 %v1262_v3, 0.0  ;;  %v1303_v1 = vmul.f32 %v2387_v60, %v1285_v11 }
 0x205   :  { %v1368_v48 = vmax.f32 %v1348_v12, 0.0  ;;  %v1306_v18 = vmul.f32 %v2392_v52, %v1288_v38 }
 0x206   :  { %v1367_v22 = vmax.f32 %v1341_v14, 0.0  ;;  %v1304_v8 = vmul.f32 %v2392_v52, %v1286_v15 }
 0x207   :  { %v1376_v9 = vpack.c.bf16 %v1368_v48, %v1368_v48  ;;  %v1356_v23 = vmax.f32 %v1305_v17, %v1306_v18 }
 0x208   :  { %v1375_v24 = vpack.c.bf16 %v1367_v22, %v1367_v22  ;;  %v1349_v26 = vmax.f32 %v1303_v1, %v1304_v8 }
 0x209   :  { %v1357_v5 = vrot.slane %v1356_v23, 4  ;;  %v1415_v28 = vunpack.c.l.b16 %v1376_v9 }
 0x20a   :  { %v1414_v27 = vunpack.c.l.b16 %v1375_v24  ;;  %v1350_v25 = vrot.slane %v1349_v26, 4 }
 0x20b   :  { %v1358_v54 = vmax.f32 %v1356_v23, %v1357_v5 }
 0x20c   :  { %v1425_v57 = vsel %vm1424_vm12, %v1414_v27, %v1423_v21  ;;  %v1351_v30 = vmax.f32 %v1349_v26, %v1350_v25 }
 0x20d   :  { %v1359_v16 = vrot.slane %v1358_v54, 2  ;;  %v1427_v32 = vsel %vm1426_vm13, %v1415_v28, %v1425_v57 }
 0x20e   :  { %v1352_v33 = vrot.slane %v1351_v30, 2 }
 0x20f   :  { %v1360_v46 = vmax.f32 %v1358_v54, %v1359_v16 }
 0x210   :  { %v1353_v60 = vmax.f32 %v1351_v30, %v1352_v33 }
 0x211   :  { %v1361_v35 = vrot.slane %v1360_v46, 1 }
 0x212   :  { %v1354_v52 = vrot.slane %v1353_v60, 1 }
 0x213   :  { %v1362_v19 = vmax.f32 %v1360_v46, %v1361_v35 }
 0x214   :  { %v1355_v37 = vmax.f32 %v1353_v60, %v1354_v52 }
 0x215   :  { %v1370_v10 = vmax.f32 %v1362_v19, 0.0 }
 0x216   :  { %v1369_v40 = vmax.f32 %v1355_v37, 0.0 }
 0x217   :  { %v1378_v41 = vpack.c.bf16 %v1370_v10, %v1370_v10 }
 0x218   :  { %v1377_v36 = vpack.c.bf16 %v1369_v40, %v1369_v40 }
 0x219   :  { %v1417_v42 = vunpack.c.l.b16 %v1378_v41 }
 0x21a   :  { %v1416_v13 = vunpack.c.l.b16 %v1377_v36 }
 0x21c   :  { %v1429_v43 = vsel %vm1428_vm14, %v1416_v13, %v1427_v32 }
 0x21d   :  { %v1431_v44 = vsel %vm1430_vm15, %v1417_v42, %v1429_v43 }
 0x21e   :  { %v1432_v29 = vpack.c.b16 %v1431_v44, %v1431_v44 }
 0x220   :  { %1939 = vmatmul.mubr.bf16.vlgmr.msra.gmra.mrb[32].mxu1 %v1432_v29 }
 0x2f3   :  { %v1516_v39 = vpop.f32.mrb[32].mxu1 }
 0x2f4   :  { %v1517_v20 = vadd.f32 %v1728_v45, %v1516_v39  ;;  %v1940_v49 = vpop.f32.mrb[33].mxu1 }
 0x2f5   :  { %v1519_v31 = vpop.f32.mrb[34].mxu1 }
 0x2f6   :  { %1522 = vst [vmem:[%s2435_s5] sm:$0xff] %v1517_v20  ;;  %v1941_v50 = vpop.f32.mrb[35].mxu1 }
 0x2f7   :  { %1527 = vsyncpa [#allocation3], 1 }

</bundles_post_ra>
